<compile_context>
chip_gen: v7x
topology: tpu7x:2x2x1
jax: 0.10.0
libtpu: 0.0.40
codegen_flags: <defaults>
</compile_context>

<pallas_src>
import functools
import numpy as np
import jax
import jax.numpy as jnp
from jax.experimental import pallas as pl
from jax.experimental.pallas import tpu as pltpu

EPS_BN = 1e-5
LANE = 128          # feature dims padded to one full vreg lane width
MAX_ROW_TILE = 256  # row tile for the A_hat @ h matmul (matches v6e/v7x MXU width)


def _round_up(x, m):
    return ((x + m - 1) // m) * m


def _pad_nodes(n):
    n_pad = _round_up(max(n, 8), 8)
    if n_pad > MAX_ROW_TILE:
        n_pad = _round_up(n_pad, MAX_ROW_TILE)
    return n_pad


# ----------------------------- Pallas kernels (hot path) -----------------------------

def _gcn_kernel(*refs, apply_relu, with_residual):
    # fused GCNConv (+ folded eval BatchNorm + optional residual + optional ReLU):
    #   h = (X [+ R]) @ W + b_in ; h = A_hat_block @ h + b_out ; h = relu(h)
    if with_residual:
        a_ref, x_ref, r_ref, w_ref, bi_ref, bo_ref, o_ref = refs
        xin = x_ref[...] + r_ref[...]              # residual add: free VPU filler
    else:
        a_ref, x_ref, w_ref, bi_ref, bo_ref, o_ref = refs
        xin = x_ref[...]
    h = jnp.dot(xin, w_ref[...], preferred_element_type=jnp.float32) + bi_ref[...]
    h = jnp.dot(a_ref[...], h.astype(jnp.bfloat16),
                preferred_element_type=jnp.float32) + bo_ref[...]
    if apply_relu:
        h = jnp.maximum(h, 0.0)
    o_ref[...] = h


def _linear_kernel(x_ref, w_ref, b_ref, o_ref):
    # lane-dense per-node projection (EdgePooling score heads)
    o_ref[...] = jnp.dot(x_ref[...], w_ref[...],
                         preferred_element_type=jnp.float32) + b_ref[...]


def pallas_gcn(a_hat, x, w, b_in, b_out, *, residual=None, apply_relu):
    n_pad, c = x.shape
    tm = min(n_pad, MAX_ROW_TILE)
    grid = (n_pad // tm,)
    ops = [a_hat.astype(jnp.bfloat16), x.astype(jnp.bfloat16)]
    specs = [pl.BlockSpec((tm, n_pad), lambda i: (i, 0)),
             pl.BlockSpec((n_pad, c), lambda i: (0, 0))]
    if residual is not None:
        ops.append(residual.astype(jnp.bfloat16))
        specs.append(pl.BlockSpec((n_pad, c), lambda i: (0, 0)))
    ops += [w.astype(jnp.bfloat16), b_in.astype(jnp.float32), b_out.astype(jnp.float32)]
    specs += [pl.BlockSpec((c, c), lambda i: (0, 0)),
              pl.BlockSpec((1, c), lambda i: (0, 0)),
              pl.BlockSpec((1, c), lambda i: (0, 0))]
    kern = functools.partial(_gcn_kernel, apply_relu=apply_relu,
                             with_residual=residual is not None)
    return pl.pallas_call(
        kern,
        out_shape=jax.ShapeDtypeStruct((n_pad, c), jnp.float32),
        grid=grid,
        in_specs=specs,
        out_specs=pl.BlockSpec((tm, c), lambda i: (i, 0)),
        compiler_params=pltpu.CompilerParams(dimension_semantics=("parallel",)),
    )(*ops)


def pallas_node_proj(x, w, b):
    n_pad, c = x.shape
    cout = w.shape[1]
    tm = min(n_pad, MAX_ROW_TILE)
    return pl.pallas_call(
        _linear_kernel,
        out_shape=jax.ShapeDtypeStruct((n_pad, cout), jnp.float32),
        grid=(n_pad // tm,),
        in_specs=[pl.BlockSpec((tm, c), lambda i: (i, 0)),
                  pl.BlockSpec((c, cout), lambda i: (0, 0)),
                  pl.BlockSpec((1, cout), lambda i: (0, 0))],
        out_specs=pl.BlockSpec((tm, cout), lambda i: (i, 0)),
        compiler_params=pltpu.CompilerParams(dimension_semantics=("parallel",)),
    )(x.astype(jnp.bfloat16), w.astype(jnp.bfloat16), b.astype(jnp.float32))


# ----------------------------- Glue (graph bookkeeping) -----------------------------

def gcn_norm_adj(edge_index, num_nodes, n_pad):
    """Dense D^{-1/2}(A+I)D^{-1/2} (PyG gcn_norm, add_remaining_self_loops),
    zero-padded to (n_pad, n_pad) and cast to bf16 for the MXU."""
    src = np.asarray(edge_index[0]).astype(np.int64)
    dst = np.asarray(edge_index[1]).astype(np.int64)
    has_loop = np.zeros(num_nodes, dtype=bool)
    has_loop[src[src == dst]] = True
    add = np.nonzero(~has_loop)[0]
    src = np.concatenate([src, add])
    dst = np.concatenate([dst, add])
    w = np.ones(src.shape[0], np.float32)
    deg = np.zeros(num_nodes, np.float32)
    np.add.at(deg, dst, w)
    dinv = np.where(deg > 0, deg ** -0.5, 0.0).astype(np.float32)
    norm = dinv[src] * w * dinv[dst]
    A = np.zeros((n_pad, n_pad), np.float32)
    np.add.at(A, (dst, src), norm)
    return jnp.asarray(A, dtype=jnp.bfloat16)


def edge_pool(x_pad, n_real, edge_index, w_score, b_score):
    """PyG EdgePooling.forward (dropout=0, add_to_edge_score=0.5), single graph.
    Edge scores come from a lane-dense per-node projection (no (E,2C) concat);
    pooled features via segment_sum (no dense assignment matmul)."""
    src = np.asarray(edge_index[0]).astype(np.int64)
    dst = np.asarray(edge_index[1]).astype(np.int64)

    # per-node score halves: col 0 = x @ w_src (+bias), col 1 = x @ w_dst
    s = pallas_node_proj(x_pad, w_score, b_score)[:n_real]
    e_raw = s[src, 0] + s[dst, 1]

    # softmax over incoming edges of each destination node
    dst_j = jnp.asarray(dst)
    seg_max = jax.ops.segment_max(e_raw, dst_j, num_segments=n_real)
    e = jnp.exp(e_raw - seg_max[dst_j])
    e = e / (jax.ops.segment_sum(e, dst_j, num_segments=n_real)[dst_j] + 1e-16)
    e = e + 0.5  # add_to_edge_score

    # TODO(synk): greedy edge matching + coalesce are sequential/data-dependent -> host
    # numpy (one device sync per pooling level; tie order may differ from torch.sort).
    e_np = np.asarray(e)
    order = np.argsort(-e_np, kind="stable")
    remaining = set(range(n_real))
    cluster = np.zeros(n_real, dtype=np.int64)
    kept_edges = []
    i = 0
    for eidx in order:
        a_n, b_n = int(src[eidx]), int(dst[eidx])
        if a_n not in remaining or b_n not in remaining:
            continue
        kept_edges.append(int(eidx))
        cluster[a_n] = i
        remaining.remove(a_n)
        if a_n != b_n:
            cluster[b_n] = i
            remaining.remove(b_n)
        i += 1
    for n in sorted(remaining):
        cluster[n] = i
        i += 1
    num_clusters = i
    new_edge_score = np.concatenate(
        [e_np[kept_edges], np.ones(num_clusters - len(kept_edges), np.float32)]
    ).astype(np.float32)

    # pooled features: segment-sum over clusters, scaled by the cluster score
    cluster_j = jnp.asarray(cluster)
    pooled = jax.ops.segment_sum(x_pad[:n_real], cluster_j, num_segments=num_clusters)
    pooled = pooled * jnp.asarray(new_edge_score)[:, None]
    nc_pad = _pad_nodes(num_clusters)
    pooled = jnp.zeros((nc_pad, x_pad.shape[1]), jnp.float32).at[:num_clusters].set(pooled)

    # coalesced coarse edge index (duplicates removed, self-loops kept)
    pairs = np.unique(np.stack([cluster[src], cluster[dst]], axis=1), axis=0)
    new_edge_index = pairs.T

    info = dict(cluster=cluster, score=new_edge_score,
                n_fine=n_real, n_fine_pad=x_pad.shape[0])
    return pooled, new_edge_index, num_clusters, info


def edge_unpool(x_coarse_pad, info):
    """PyG EdgePooling.unpool as an index gather: (x / score)[cluster]."""
    idx = np.zeros(info["n_fine_pad"], np.int32)
    idx[:info["n_fine"]] = info["cluster"]
    idx_j = jnp.asarray(idx)
    inv = jnp.asarray((1.0 / info["score"]).astype(np.float32))
    return jnp.take(x_coarse_pad, idx_j, axis=0) * jnp.take(inv, idx_j)[:, None]


# ----------------------------- Parameters -----------------------------

def init_params(key, in_c, hid, out_c, depth):
    keys = iter(jax.random.split(key, 64))

    def rn(shape, scale=0.1):
        return scale * jax.random.normal(next(keys), shape, jnp.float32)

    def pad_mat(w):
        return jnp.zeros((LANE, LANE), jnp.float32).at[:w.shape[0], :w.shape[1]].set(w)

    def pad_row(b):
        return jnp.zeros((1, LANE), jnp.float32).at[:, :b.shape[1]].set(b)

    def bn_fold(w, b, c_out):
        # BatchNorm1d eval mode with default running stats (weight=1, bias=0,
        # running_mean=0, running_var=1) folded into the conv: W*gamma, b*gamma+beta.
        gamma = jnp.full((c_out,), 1.0 / np.sqrt(1.0 + EPS_BN), jnp.float32)
        beta = jnp.zeros((c_out,), jnp.float32)
        return w * gamma[None, :], b * gamma[None, :] + beta[None, :]

    params = {"out_c": out_c}

    # raw (unfolded) parameters
    w_pre, b_pre = rn((in_c, hid)), rn((1, hid), 0.01)
    up_w_raw = [rn((hid, hid)) for _ in range(depth + 1)]
    up_b_raw = [rn((1, hid), 0.01) for _ in range(depth + 1)]
    down_dims = [out_c] + [hid] * (depth - 1)
    down_w_raw = [rn((hid, d)) for d in down_dims]
    down_b_raw = [rn((1, d), 0.01) for d in down_dims]
    pool_w_raw = [rn((2 * hid, 1)) for _ in range(depth)]
    pool_b_raw = [rn((1, 1), 0.01) for _ in range(depth)]

    # up path: fold BN; fold the pre-embedding Linear into up conv 0
    up_w, up_bin, up_bout = [], [], []
    w0, b0 = bn_fold(up_w_raw[0], up_b_raw[0], hid)
    up_w.append(pad_mat(w_pre @ w0))          # W0' = W_pre @ (W_up0 * gamma)
    up_bin.append(pad_row(b_pre @ w0))        # inner bias (applied before A_hat @ .)
    up_bout.append(pad_row(b0))
    for l in range(1, depth + 1):
        wl, bl = bn_fold(up_w_raw[l], up_b_raw[l], hid)
        up_w.append(pad_mat(wl))
        up_bin.append(jnp.zeros((1, LANE), jnp.float32))
        up_bout.append(pad_row(bl))
    params["up_w"], params["up_bin"], params["up_bout"] = up_w, up_bin, up_bout

    # down path: fold BN
    down_w, down_bin, down_bout = [], [], []
    for l in range(depth):
        wl, bl = bn_fold(down_w_raw[l], down_b_raw[l], down_dims[l])
        down_w.append(pad_mat(wl))
        down_bin.append(jnp.zeros((1, LANE), jnp.float32))
        down_bout.append(pad_row(bl))
    params["down_w"], params["down_bin"], params["down_bout"] = down_w, down_bin, down_bout

    # EdgePooling score heads: Linear(2C -> 1) split into per-node src/dst columns
    pool_w, pool_b = [], []
    for l in range(depth):
        w2 = pool_w_raw[l]
        W = jnp.zeros((LANE, LANE), jnp.float32)
        W = W.at[:hid, 0].set(w2[:hid, 0]).at[:hid, 1].set(w2[hid:, 0])
        B = jnp.zeros((1, LANE), jnp.float32).at[0, 0].set(pool_b_raw[l][0, 0])
        pool_w.append(W)
        pool_b.append(B)
    params["pool_w"], params["pool_b"] = pool_w, pool_b
    return params


# ----------------------------- Forward pass -----------------------------

def hierarchical_graphnet_forward(params, x, edge_index, depth):
    # single-graph batch (batch = zeros) -> batch bookkeeping is a no-op here
    n0 = x.shape[0]
    n0_pad = _pad_nodes(n0)

    # pad features to a lane-dense (n0_pad, 128) slab; the node pre-embedding is
    # folded into up conv 0, so there is no separate Linear pallas_call.
    x_pad = jnp.zeros((n0_pad, LANE), jnp.float32).at[:n0, :x.shape[1]].set(x)

    ei = np.asarray(edge_index)
    A0 = gcn_norm_adj(ei, n0, n0_pad)         # built once, reused by down conv 0
    x_pad = pallas_gcn(A0, x_pad, params["up_w"][0], params["up_bin"][0],
                       params["up_bout"][0], apply_relu=True)

    xs, a_list, infos = [x_pad], [A0], []
    n_cur = n0
    for level in range(1, depth + 1):
        pooled, ei, n_cur, info = edge_pool(
            x_pad, n_cur, ei, params["pool_w"][level - 1], params["pool_b"][level - 1])
        A = gcn_norm_adj(ei, n_cur, pooled.shape[0])
        x_pad = pallas_gcn(A, pooled, params["up_w"][level], params["up_bin"][level],
                           params["up_bout"][level], apply_relu=True)
        infos.append(info)
        if level < depth:
            xs.append(x_pad)
            a_list.append(A)

    for level in reversed(range(depth)):
        res = xs[level]
        unpooled = edge_unpool(x_pad, infos[level])   # index gather, no dense U matmul
        # fused down step: (res + unpooled) @ W ; A_hat @ h + b ; relu (skip on last)
        x_pad = pallas_gcn(a_list[level], res, params["down_w"][level],
                           params["down_bin"][level], params["down_bout"][level],
                           residual=unpooled, apply_relu=(level > 0))

    return x_pad[:n0, :params["out_c"]]


# ----------------------------- Demo -----------------------------

if __name__ == "__main__":
    IN_C, HID, OUT_C, DEPTH = 16, 32, 8, 2
    N = 16

    key = jax.random.PRNGKey(0)
    kx, kp = jax.random.split(key)

    # undirected ring graph with both directed edges per undirected edge
    s_idx = np.arange(N)
    t_idx = (s_idx + 1) % N
    edge_index = np.stack([np.concatenate([s_idx, t_idx]),
                           np.concatenate([t_idx, s_idx])]).astype(np.int64)
    x = jax.random.normal(kx, (N, IN_C), jnp.float32)

    params = init_params(kp, IN_C, HID, OUT_C, DEPTH)
    out = hierarchical_graphnet_forward(params, x, edge_index, DEPTH)
    out = jax.block_until_ready(out)

    assert out.shape == (N, OUT_C), out.shape
    assert bool(jnp.all(jnp.isfinite(out)))
    print("KERNEL_OK")
</pallas_src>

<mosaic_0001>
module attributes {stable_mosaic.version = 11 : i64} {
  func.func @_gcn_kernel(%arg0: i32, %arg1: memref<16x16xbf16, #tpu.memory_space<vmem>>, %arg2: memref<16x128xbf16, #tpu.memory_space<vmem>>, %arg3: memref<128x128xbf16, #tpu.memory_space<vmem>>, %arg4: memref<1x128xf32, #tpu.memory_space<vmem>>, %arg5: memref<1x128xf32, #tpu.memory_space<vmem>>, %arg6: memref<16x128xf32, #tpu.memory_space<vmem>>) attributes {dimension_semantics = [#tpu.dimension_semantics<parallel>], iteration_bounds = array<i64: 1>, scalar_prefetch = 0 : i64, scratch_operands = 0 : i64, tpu.core_type = #tpu.core_type<tc>, window_params = [{transform_indices = @transform_0, window_bounds = array<i64: 16, 16>}, {pipeline_mode = #tpu.pipeline_mode<synchronous>, transform_indices = @transform_1, window_bounds = array<i64: 16, 128>}, {pipeline_mode = #tpu.pipeline_mode<synchronous>, transform_indices = @transform_2, window_bounds = array<i64: 128, 128>}, {pipeline_mode = #tpu.pipeline_mode<synchronous>, transform_indices = @transform_3, window_bounds = array<i64: 1, 128>}, {pipeline_mode = #tpu.pipeline_mode<synchronous>, transform_indices = @transform_4, window_bounds = array<i64: 1, 128>}, {transform_indices = @transform_5, window_bounds = array<i64: 16, 128>}]} {
    %c0 = arith.constant 0 : index
    %c0_0 = arith.constant 0 : index
    %0 = vector.load %arg2[%c0, %c0_0] : memref<16x128xbf16, #tpu.memory_space<vmem>>, vector<16x128xbf16>
    %c0_1 = arith.constant 0 : index
    %c0_2 = arith.constant 0 : index
    %1 = vector.load %arg3[%c0_1, %c0_2] : memref<128x128xbf16, #tpu.memory_space<vmem>>, vector<128x128xbf16>
    %cst = arith.constant dense<0.000000e+00> : vector<16x128xf32>
    %2 = tpu.matmul %0, %1, %cst {dimension_numbers = #tpu.dot_dimension_numbers<[1], [0], [0], [1], [0, 0, 1, 1], [], []>} : vector<16x128xbf16>, vector<128x128xbf16>, vector<16x128xf32> -> vector<16x128xf32>
    %c0_3 = arith.constant 0 : index
    %c0_4 = arith.constant 0 : index
    %3 = vector.load %arg4[%c0_3, %c0_4] : memref<1x128xf32, #tpu.memory_space<vmem>>, vector<1x128xf32>
    %4 = vector.broadcast %3 : vector<1x128xf32> to vector<16x128xf32>
    %5 = arith.addf %2, %4 : vector<16x128xf32>
    %c0_5 = arith.constant 0 : index
    %c0_6 = arith.constant 0 : index
    %6 = vector.load %arg1[%c0_5, %c0_6] : memref<16x16xbf16, #tpu.memory_space<vmem>>, vector<16x16xbf16>
    %7 = arith.truncf %5 : vector<16x128xf32> to vector<16x128xbf16>
    %cst_7 = arith.constant dense<0.000000e+00> : vector<16x128xf32>
    %8 = tpu.matmul %6, %7, %cst_7 {dimension_numbers = #tpu.dot_dimension_numbers<[1], [0], [0], [1], [0, 0, 1, 1], [], []>} : vector<16x16xbf16>, vector<16x128xbf16>, vector<16x128xf32> -> vector<16x128xf32>
    %c0_8 = arith.constant 0 : index
    %c0_9 = arith.constant 0 : index
    %9 = vector.load %arg5[%c0_8, %c0_9] : memref<1x128xf32, #tpu.memory_space<vmem>>, vector<1x128xf32>
    %10 = vector.broadcast %9 : vector<1x128xf32> to vector<16x128xf32>
    %11 = arith.addf %8, %10 : vector<16x128xf32>
    %cst_10 = arith.constant 0.000000e+00 : f32
    %12 = vector.broadcast %cst_10 : f32 to vector<16x128xf32>
    %13 = arith.maximumf %11, %12 : vector<16x128xf32>
    %c0_11 = arith.constant 0 : index
    %c0_12 = arith.constant 0 : index
    %14 = vector.load %arg6[%c0_11, %c0_12] : memref<16x128xf32, #tpu.memory_space<vmem>>, vector<16x128xf32>
    tpu.vector_store %arg6[%c0_11, %c0_12], %13 {strides = array<i32>} : memref<16x128xf32, #tpu.memory_space<vmem>>, vector<16x128xf32>,
    return
  }
  func.func @transform_0(%arg0: i32) -> (i32, i32) {
    %c0_i32 = arith.constant 0 : i32
    %c0_i32_0 = arith.constant 0 : i32
    return %arg0, %c0_i32 : i32, i32
  }
  func.func @transform_1(%arg0: i32) -> (i32, i32) {
    %c0_i32 = arith.constant 0 : i32
    %c0_i32_0 = arith.constant 0 : i32
    %c0_i32_1 = arith.constant 0 : i32
    return %c0_i32, %c0_i32_0 : i32, i32
  }
  func.func @transform_2(%arg0: i32) -> (i32, i32) {
    %c0_i32 = arith.constant 0 : i32
    %c0_i32_0 = arith.constant 0 : i32
    %c0_i32_1 = arith.constant 0 : i32
    return %c0_i32, %c0_i32_0 : i32, i32
  }
  func.func @transform_3(%arg0: i32) -> (i32, i32) {
    %c0_i32 = arith.constant 0 : i32
    %c0_i32_0 = arith.constant 0 : i32
    %c0_i32_1 = arith.constant 0 : i32
    return %c0_i32, %c0_i32_0 : i32, i32
  }
  func.func @transform_4(%arg0: i32) -> (i32, i32) {
    %c0_i32 = arith.constant 0 : i32
    %c0_i32_0 = arith.constant 0 : i32
    %c0_i32_1 = arith.constant 0 : i32
    return %c0_i32, %c0_i32_0 : i32, i32
  }
  func.func @transform_5(%arg0: i32) -> (i32, i32) {
    %c0_i32 = arith.constant 0 : i32
    %c0_i32_0 = arith.constant 0 : i32
    return %arg0, %c0_i32 : i32, i32
  }
}

</mosaic_0001>

<bundles_post_ra>
// kernel: tpu_custom_call.1
= control target key start
LH: loop header
LB: loop body
LE: loop exit
PB: predicated region body
PF: predicated region fallthrough
CT: control target
= control target key end

     0   :  { %10 = vsyncpa [#allocation3], 0  ;;  %s539_s0 = inlined_call_operand.hbm [shape: bf16[16,16], index: 0, kind: input, shape index: {}]   ;;  %s540_s1 = inlined_call_operand.hbm [shape: bf16[16,128], index: 1, kind: input, shape index: {}]   ;;  %s541_s2 = inlined_call_operand.hbm [shape: bf16[128,128], index: 2, kind: input, shape index: {}]   ;;  %s542_s3 = inlined_call_operand.vmem [shape: f32[1,128], index: 3, kind: input, shape index: {}]   ;;  %s543_s4 = inlined_call_operand.vmem [shape: f32[1,128], index: 4, kind: input, shape index: {}]   ;;  %s544_s5 = inlined_call_operand.hbm [shape: f32[16,128], index: 5, kind: output, shape index: {}]  }
   0x1   :  { %11 = vsyncpa [#allocation6], 0 }
   0x2   :  { %12 = vsyncpa [#allocation4], 0  ;;  %s429_s18 = smov [#allocation5]   ;;  %s430_s20 = smov [#allocation2]  }
   0x3   :  { %s30_s19 = sshll.u32 %s429_s18, 4  ;;  %s18_s21 = sshll.u32 %s430_s20, 4  ;;  %s31_s19 = int_to_ptr.vmem [resolvable:$true] %s30_s19  ;;  %s469_s21 = int_to_ptr.vmem [resolvable:$true] %s18_s21 }
   0x4   :  { %s335_s24 = scalar_lea.hbm %s540_s1, 128 }
   0x5   :  { %p336_p0 = scmp.ne.s32.totalorder %s540_s1, %s335_s24  ;;  %p339_p1 = scmp.lt.u32.totalorder %s335_s24, %s540_s1 }
   0x7   :  { %p341_p2 = pnand %p339_p1, %p336_p0 }
   0x9   :  { %344 = shalt.err (!%p341_p2)
}
   0xa   :  { %s345_s29 = scalar_lea.vmem %s31_s19, 128  ;;  %p350_p4 = scmp.lt.s32.totalorder %s31_s19, %s31_s19 }
   0xb   :  { %p346_p3 = scmp.ne.s32.totalorder %s31_s19, %s345_s29  ;;  %p351_p5 = scmp.lt.s32.totalorder %s345_s29, %s345_s29 }
   0xd   :  { %p352_p6 = por %p351_p5, %p350_p4 }
   0xf   :  { %p353_p7 = pnand %p352_p6, %p346_p3 }
  0x11   :  { %356 = shalt.err (!%p353_p7)
}
  0x12   :  { %s431_s30 = smov 64   ;;  %s432_s6 = smov 4  }
  0x13   :  { %36 = dma.hbm_to_vmem [thread:$0]  %s540_s1, 128, %s31_s19, [#allocation6], %s431_s30, %s431_s30, %s432_s6  }
  0x14   :  { %s357_s11 = scalar_lea.hbm %s539_s0, 128 }
  0x15   :  { %p358_p8 = scmp.ne.s32.totalorder %s539_s0, %s357_s11  ;;  %p361_p9 = scmp.lt.u32.totalorder %s357_s11, %s539_s0 }
  0x17   :  { %p363_p10 = pnand %p361_p9, %p358_p8 }
  0x19   :  { %366 = shalt.err (!%p363_p10)
}
  0x1a   :  { %s367_s16 = scalar_lea.vmem %s469_s21, 128  ;;  %p372_p12 = scmp.lt.s32.totalorder %s469_s21, %s469_s21 }
  0x1b   :  { %p368_p11 = scmp.ne.s32.totalorder %s469_s21, %s367_s16  ;;  %p373_p13 = scmp.lt.s32.totalorder %s367_s16, %s367_s16 }
  0x1d   :  { %p374_p0 = por %p373_p13, %p372_p12 }
  0x1f   :  { %p375_p1 = pnand %p374_p0, %p368_p11 }
  0x21   :  { %378 = shalt.err (!%p375_p1)
}
  0x22   :  { %24 = dma.hbm_to_vmem [thread:$0]  %s539_s0, 128, %s469_s21, [#allocation3], %s431_s30, %s431_s30, %s432_s6  }
  0x23   :  { %s433_s18 = smov [#allocation7]   ;;  %s379_s23 = scalar_lea.hbm %s541_s2, 1024 }
  0x24   :  { %s42_s19 = sshll.u32 %s433_s18, 4  ;;  %p380_p2 = scmp.ne.s32.totalorder %s541_s2, %s379_s23  ;;  %s43_s19 = int_to_ptr.vmem [resolvable:$true] %s42_s19 }
  0x25   :  { %p383_p3 = scmp.lt.u32.totalorder %s379_s23, %s541_s2 }
  0x27   :  { %p385_p4 = pnand %p383_p3, %p380_p2 }
  0x29   :  { %388 = shalt.err (!%p385_p4)
}
  0x2a   :  { %s389_s28 = scalar_lea.vmem %s43_s19, 1024  ;;  %p394_p6 = scmp.lt.s32.totalorder %s43_s19, %s43_s19 }
  0x2b   :  { %p390_p5 = scmp.ne.s32.totalorder %s43_s19, %s389_s28  ;;  %p395_p7 = scmp.lt.s32.totalorder %s389_s28, %s389_s28 }
  0x2d   :  { %p396_p8 = por %p395_p7, %p394_p6 }
  0x2f   :  { %p397_p9 = pnand %p396_p8, %p390_p5 }
  0x31   :  { %400 = shalt.err (!%p397_p9)
}
  0x32   :  { %48 = dma.hbm_to_vmem [thread:$0]  %s541_s2, 1024, %s43_s19, [#allocation6], %s431_s30, %s431_s30, %s432_s6  }
  0x33   :  { %423 = dma.done.wait [#allocation3], 128  }
  0x34   :  { %424 = vsyncadd [#allocation3], 4294967168 }
  0x35   :  { %425 = dma.done.wait [#allocation6], 1152  }
  0x36   :  { %426 = vsyncadd [#allocation6], 4294966144  ;;  %v434_v0 = vmov 0.0   ;;  %vm435_vm0 = vmmov 0   ;;  %v325_v1 = vld [vmem:[#allocation7] sm:$0xff]   ;;  %v326_v2 = vld [vmem:[#allocation7 + $0x8] sm:$0xff]  }
  0x37   :  { %289 = vmatprep.subr.bf16.mxu0 %v434_v0  ;;  %305 = vmatprep.mubr.msk.bf16.mxu0 %vm435_vm0, %v434_v0  ;;  %v327_v3 = vld [vmem:[#allocation7 + $0x10] sm:$0xff]   ;;  %v328_v4 = vld [vmem:[#allocation7 + $0x18] sm:$0xff]   ;;  %v329_v5 = vld [vmem:[#allocation7 + $0x20] sm:$0xff]   ;;  %vm198_vm1 = vcmask 130048   ;;  %s436_s7 = smov [#allocation8]  }
  0x38   :  { %309 = vmatprep.subr.bf16.mxu1 %v434_v0  ;;  %311 = vmatprep.mubr.msk.bf16.mxu1 %vm435_vm0, %v434_v0  ;;  %v330_v6 = vld [vmem:[#allocation7 + $0x28] sm:$0xff]   ;;  %v331_v7 = vld [vmem:[#allocation7 + $0x30] sm:$0xff]   ;;  %v332_v8 = vld [vmem:[#allocation7 + $0x38] sm:$0xff]  }
  0x39   :  { %290 = vmatpush3.bf16.msra.mxu0 %v325_v1  ;;  %v333_v9 = vld [vmem:[#allocation5] sm:$0xff]   ;;  %v265_v10 = vld [vmem:[%s542_s3] ss:$0 sm:$0xff]  ;;  %s252_s3 = sshll.u32 %s436_s7, 4  ;;  %s253_s3 = int_to_ptr.vmem [resolvable:$true] %s252_s3 }
  0x3a   :  { %291 = vmatprep.subr.bf16.mxu0 %v434_v0  ;;  %v334_v18 = vld [vmem:[#allocation2] sm:$0xff]   ;;  %s401_s8 = scalar_lea.vmem %s253_s3, 256  ;;  %p406_p11 = scmp.lt.s32.totalorder %s253_s3, %s253_s3 }
  0x3b   :  { %v275_v19 = vld [vmem:[%s543_s4] ss:$0 sm:$0xff]  ;;  %p402_p10 = scmp.ne.s32.totalorder %s253_s3, %s401_s8  ;;  %p407_p12 = scmp.lt.s32.totalorder %s401_s8, %s401_s8 }
  0x3d   :  { %292 = vmatpush3.bf16.msra.mxu0 %v326_v2  ;;  %p408_p13 = por %p407_p12, %p406_p11 }
  0x3e   :  { %293 = vmatprep.subr.bf16.mxu0 %v434_v0 }
  0x3f   :  { %p409_p0 = pnand %p408_p13, %p402_p10 }
  0x41   :  { %294 = vmatpush3.bf16.msra.mxu0 %v327_v3 }
  0x42   :  { %295 = vmatprep.subr.bf16.mxu0 %v434_v0 }
  0x45   :  { %296 = vmatpush3.bf16.msra.mxu0 %v328_v4 }
  0x46   :  { %297 = vmatprep.subr.bf16.mxu0 %v434_v0 }
  0x49   :  { %298 = vmatpush3.bf16.msra.mxu0 %v329_v5 }
  0x4a   :  { %299 = vmatprep.subr.bf16.mxu0 %v434_v0 }
  0x4d   :  { %300 = vmatpush3.bf16.msra.mxu0 %v330_v6 }
  0x4e   :  { %301 = vmatprep.subr.bf16.mxu0 %v434_v0 }
  0x51   :  { %302 = vmatpush3.bf16.msra.mxu0 %v331_v7 }
  0x52   :  { %303 = vmatprep.subr.bf16.mxu0 %v434_v0 }
  0x55   :  { %304 = vmatpush3.bf16.msra.mxu0 %v332_v8 }
  0x58   :  { %306 = vmatmul.mubr.bf16.vlgmr.msra.gmra.mrb[0].mxu0 %v333_v9 }
 0x12b   :  { %v176_v11 = vpop.f32.mrb[0].mxu0 }
 0x12c   :  { %v307_v12 = vpop.f32.mrb[1].mxu0  ;;  %v177_v14 = vadd.f32 %v265_v10, %v176_v11 }
 0x12d   :  { %v179_v13 = vpop.f32.mrb[2].mxu0 }
 0x12e   :  { %v180_v15 = vadd.f32 %v265_v10, %v179_v13  ;;  %v308_v16 = vpop.f32.mrb[3].mxu0 }
 0x130   :  { %v185_v17 = vpack.c.bf16 %v180_v15, %v177_v14 }
 0x132   :  { %310 = vmatpush3.bf16.msra.mxu1 %v185_v17 }
 0x135   :  { %312 = vmatmul.mubr.msk.bf16.vlgmr.msra.gmra.mrb[0].mxu1 %vm198_vm1, %v334_v18 }
 0x208   :  { %v236_v20 = vpop.f32.mrb[0].mxu1 }
 0x209   :  { %v237_v21 = vadd.f32 %v275_v19, %v236_v20  ;;  %v313_v22 = vpop.f32.mrb[1].mxu1 }
 0x20a   :  { %v239_v23 = vpop.f32.mrb[2].mxu1 }
 0x20b   :  { %v243_v24 = vmax.f32 %v237_v21, 0.0  ;;  %v240_v25 = vadd.f32 %v275_v19, %v239_v23  ;;  %v314_v26 = vpop.f32.mrb[3].mxu1 }
 0x20d   :  { %245 = vst [vmem:[#allocation8] sm:$0xff] %v243_v24  ;;  %v244_v27 = vmax.f32 %v240_v25, 0.0 }
 0x20f   :  { %246 = vst [vmem:[#allocation8 + $0x8] sm:$0xff] %v244_v27 }
 0x210   :  { %412 = shalt.err (!%p409_p0)
}
 0x211   :  { %s413_s10 = scalar_lea.hbm %s544_s5, 256 }
 0x212   :  { %p414_p1 = scmp.ne.s32.totalorder %s544_s5, %s413_s10  ;;  %p417_p2 = scmp.lt.u32.totalorder %s413_s10, %s544_s5 }
 0x214   :  { %p419_p3 = pnand %p417_p2, %p414_p1 }
 0x216   :  { %422 = shalt.err (!%p419_p3)
}
 0x217   :  { %s437_s15 = smov 128   ;;  %s438_s16 = smov 8  }
 0x218   :  { %258 = dma.vmem_to_hbm [thread:$0]  %s253_s3, 256, %s544_s5, [#allocation4], %s437_s15, %s437_s15, %s438_s16  }
 0x219   :  { %427 = dma.done.wait [#allocation4], 256  }
 0x21a   :  { %428 = vsyncadd [#allocation4], 4294967040 }
 0x21b   :  { %262 = vsyncpa [#allocation3], 1 }
 0x21c   :  { %263 = vsyncpa [#allocation6], 1 }
 0x21d   :  { %264 = vsyncpa [#allocation4], 1 }

</bundles_post_ra>
